<compile_context>
chip_gen: v5e
topology: v5e:2x2
jax: 0.10.0
libtpu: 0.0.40
codegen_flags: <defaults>
</compile_context>

<pallas_src>
import functools

import jax
import jax.numpy as jnp
from jax.experimental import pallas as pl
from jax.experimental.pallas import tpu as pltpu


def _spatial_loss_kernel(x_ref, oy_ref, oz_ref, carry_ref, accy_ref, accz_ref,
                         *, h, c, wc, tm, total_blocks, ragged, has_empty,
                         use_roll):
    p = pl.program_id(0)          # part (TensorCore split), "parallel"
    i = pl.program_id(1)          # row-tile within the part, "arbitrary"
    nt = pl.num_programs(1)
    gi = p * nt + i               # global row-block index (may exceed last real block)

    @pl.when(i == 0)
    def _init():
        accy_ref[...] = jnp.zeros_like(accy_ref)
        accz_ref[...] = jnp.zeros_like(accz_ref)

    x = x_ref[...]                # (tm, wc), input dtype

    # ---- h-direction boundary pair with the previous tile of this part ----
    bnd = i > 0
    if has_empty:
        bnd = jnp.logical_and(bnd, gi < total_blocks)

    @pl.when(bnd)
    def _boundary():
        d = jnp.abs(x[0:1, :] - carry_ref[...]).astype(jnp.float32)
        accy_ref[...] = accy_ref[...] + d

    carry_ref[...] = x[tm - 1:tm, :]   # carried last row (input dtype)

    def _accumulate(masked):
        # ---- w-direction diff (mpz) ----
        if use_roll:
            xs = pltpu.roll(x, shift=wc - c, axis=1)   # lane rotate on the XLU
            dz = jnp.abs(xs - x)                       # wrap lanes excluded at finalize
        else:
            dz = jnp.abs(x[:, c:] - x[:, :wc - c])     # (tm, wc - c)
        if masked:
            row = gi * tm + jax.lax.broadcasted_iota(jnp.int32, (tm, 1), 0)
            dz = jnp.where(row < h, dz, jnp.zeros_like(dz))
        accz_ref[...] = accz_ref[...] + jnp.sum(
            dz.astype(jnp.float32), axis=0, keepdims=True)

        # ---- h-direction diff (mpy) within the tile ----
        dy = jnp.abs(x[1:, :] - x[:tm - 1, :])         # (tm - 1, wc)
        if masked:
            rowt = gi * tm + jax.lax.broadcasted_iota(jnp.int32, (tm - 1, 1), 0)
            dy = jnp.where(rowt < h - 1, dy, jnp.zeros_like(dy))
        accy_ref[...] = accy_ref[...] + jnp.sum(
            dy.astype(jnp.float32), axis=0, keepdims=True)

    full_blocks = total_blocks - 1 if ragged else total_blocks
    if (not ragged) and (not has_empty):
        _accumulate(masked=False)            # fast path: every tile is full
    else:
        @pl.when(gi < full_blocks)
        def _full_tile():
            _accumulate(masked=False)

        if ragged:
            @pl.when(gi == total_blocks - 1)
            def _partial_tile():
                _accumulate(masked=True)     # masking only on the one ragged tile

    # ---- finalize this part: one cross-lane reduction, write raw sums ----
    @pl.when(i == nt - 1)
    def _finalize():
        sy = jnp.sum(accy_ref[...], axis=1, keepdims=True)          # (1, 1)
        if use_roll:
            # Robust wrap-lane exclusion: probe the rotate convention once and
            # pick the matching valid-lane window (cost: a few ops per part).
            probe = jax.lax.broadcasted_iota(jnp.float32, (8, 128), 1)
            rp = pltpu.roll(probe, shift=1, axis=1)
            rolls_like_jnp = rp[0:1, 0:1] > 64.0                     # (1, 1) bool
            sz_lo = jnp.sum(accz_ref[0:1, 0:wc - c], axis=1, keepdims=True)
            sz_hi = jnp.sum(accz_ref[0:1, c:wc], axis=1, keepdims=True)
            sz = jnp.where(rolls_like_jnp, sz_lo, sz_hi)
        else:
            sz = jnp.sum(accz_ref[...], axis=1, keepdims=True)
        oy_ref[...] = jnp.broadcast_to(sy.reshape(1, 1, 1), oy_ref.shape)
        oz_ref[...] = jnp.broadcast_to(sz.reshape(1, 1, 1), oz_ref.shape)


def _tpu_vmem_capacity_bytes():
    try:
        info = pltpu.get_tpu_info()
        for name in ("vmem_capacity_bytes", "vmem_bytes", "vmem_size_bytes"):
            v = getattr(info, name, None)
            if v:
                return int(v)
    except Exception:
        pass
    return 64 * 1024 * 1024   # conservative (v7x per-core VMEM)


@functools.partial(jax.jit, static_argnames=("tile_rows", "parts", "use_roll"))
def spatial_loss(output_map, *, tile_rows=None, parts=None, use_roll=None):
    """Pallas equivalent of SpatialLoss(h, w, channels).forward(output_map)."""
    h, w, c = output_map.shape
    if h < 2 or w < 2:
        raise ValueError("spatial_loss needs h >= 2 and w >= 2")
    wc = w * c
    dtype = output_map.dtype
    itemsize = jnp.dtype(dtype).itemsize
    x2d = output_map.reshape(h, wc)        # free row-major view

    # Generation-dependent tile / VMEM budget.
    vmem = _tpu_vmem_capacity_bytes()
    if vmem >= 96 * 1024 * 1024:           # v5e / v6e: 128 MiB VMEM per core
        block_target, vmem_limit = 8 * 1024 * 1024, 96 * 1024 * 1024
    else:                                   # v7x: 64 MiB VMEM per core
        block_target, vmem_limit = 4 * 1024 * 1024, 48 * 1024 * 1024

    if tile_rows is None:
        tm = (block_target // max(1, wc * itemsize)) // 8 * 8
        tm = max(8, tm)
    else:
        tm = int(tile_rows)
    if tm >= h:
        tm = h                               # single full-extent block
    else:
        tm = max(8, (tm // 8) * 8)           # (8, 128) BlockSpec rule on sublanes

    total_blocks = -(-h // tm)
    ragged = total_blocks * tm != h

    if parts is None:
        parts = 2 if total_blocks >= 2 else 1   # 2-TC split on v7x; benign elsewhere
    P = max(1, min(int(parts), total_blocks))
    nt = -(-total_blocks // P)
    has_empty = P * nt > total_blocks

    if use_roll is None:
        use_roll = (wc % 128 == 0)           # lane-aligned: use the XLU rotate path
    accz_cols = wc if use_roll else wc - c

    if has_empty:
        last_block = total_blocks - 1        # clamp so no DMA starts past the array
        x_map = lambda pp, ii: (jnp.minimum(pp * nt + ii, last_block), 0)
    else:
        x_map = lambda pp, ii: (pp * nt + ii, 0)

    kernel = functools.partial(
        _spatial_loss_kernel, h=h, c=c, wc=wc, tm=tm,
        total_blocks=total_blocks, ragged=ragged, has_empty=has_empty,
        use_roll=use_roll)

    oy, oz = pl.pallas_call(
        kernel,
        out_shape=(jax.ShapeDtypeStruct((P, 1, 128), jnp.float32),
                   jax.ShapeDtypeStruct((P, 1, 128), jnp.float32)),
        grid_spec=pltpu.PrefetchScalarGridSpec(
            num_scalar_prefetch=0,
            grid=(P, nt),
            in_specs=[pl.BlockSpec((tm, wc), x_map)],
            out_specs=[pl.BlockSpec((1, 1, 128), lambda pp, ii: (pp, 0, 0)),
                       pl.BlockSpec((1, 1, 128), lambda pp, ii: (pp, 0, 0))],
            scratch_shapes=[
                pltpu.VMEM((1, wc), dtype),               # carried last row
                pltpu.VMEM((1, wc), jnp.float32),         # per-lane sum |mpy|
                pltpu.VMEM((1, accz_cols), jnp.float32),  # per-lane sum |mpz|
            ],
        ),
        compiler_params=pltpu.CompilerParams(
            dimension_semantics=("parallel", "arbitrary"),
            vmem_limit_bytes=vmem_limit),
    )(x2d)

    sum_y = jnp.sum(oy[:, 0, 0])
    sum_z = jnp.sum(oz[:, 0, 0])
    # Cross-part h-boundary row pairs (at most P-1 rows): tiny XLA-side fixup.
    for pp in range(1, P):
        r = pp * nt * tm
        if r < h:
            sum_y = sum_y + jnp.sum(
                jnp.abs(x2d[r, :] - x2d[r - 1, :]).astype(jnp.float32))

    n_mpy = float((h - 1) * wc)        # (h-1) * w * c
    n_mpz = float(h * (wc - c))        # h * (w-1) * c
    return sum_y / n_mpy + sum_z / n_mpz


def _reference_spatial_loss(x):
    mpy = x[1:, :, :] - x[:-1, :, :]
    mpz = x[:, 1:, :] - x[:, :-1, :]
    return jnp.mean(jnp.abs(mpy)) + jnp.mean(jnp.abs(mpz))


if __name__ == "__main__":
    # Primary shape implied by the module: (h, w, channels) = (16, 16, 4).
    x = jax.random.normal(jax.random.PRNGKey(0), (16, 16, 4), dtype=jnp.float32)
    ref = jax.block_until_ready(_reference_spatial_loss(x))
    out = jax.block_until_ready(spatial_loss(x))
    assert jnp.allclose(out, ref, rtol=1e-5, atol=1e-5), (out, ref)

    # Multi-tile, two-part grid: cross-part boundary + clamped empty tail block.
    x2 = jax.random.normal(jax.random.PRNGKey(0), (40, 16, 4), dtype=jnp.float32)
    ref2 = jax.block_until_ready(_reference_spatial_loss(x2))
    out2 = jax.block_until_ready(spatial_loss(x2, tile_rows=8))
    assert jnp.allclose(out2, ref2, rtol=1e-5, atol=1e-5), (out2, ref2)

    # Ragged last tile (h not a multiple of the tile) + two parts.
    x3 = jax.random.normal(jax.random.PRNGKey(0), (43, 16, 4), dtype=jnp.float32)
    ref3 = jax.block_until_ready(_reference_spatial_loss(x3))
    out3 = jax.block_until_ready(spatial_loss(x3, tile_rows=16))
    assert jnp.allclose(out3, ref3, rtol=1e-5, atol=1e-5), (out3, ref3)

    # Lane-aligned width (w*c == 128): exercises the pltpu.roll w-diff path
    # together with ragged masking, parts and the cross-part boundary fixup.
    x4 = jax.random.normal(jax.random.PRNGKey(0), (21, 32, 4), dtype=jnp.float32)
    ref4 = jax.block_until_ready(_reference_spatial_loss(x4))
    out4 = jax.block_until_ready(spatial_loss(x4, tile_rows=8))
    assert jnp.allclose(out4, ref4, rtol=1e-5, atol=1e-5), (out4, ref4)

    print("KERNEL_OK")
</pallas_src>

<mosaic_0001>
module attributes {stable_mosaic.version = 11 : i64} {
  func.func @_spatial_loss_kernel(%arg0: i32, %arg1: i32, %arg2: memref<16x64xf32, #tpu.memory_space<vmem>>, %arg3: memref<1x1x128xf32, #tpu.memory_space<vmem>>, %arg4: memref<1x1x128xf32, #tpu.memory_space<vmem>>, %arg5: memref<1x64xf32, #tpu.memory_space<vmem>>, %arg6: memref<1x64xf32, #tpu.memory_space<vmem>>, %arg7: memref<1x60xf32, #tpu.memory_space<vmem>>) attributes {dimension_semantics = [#tpu.dimension_semantics<parallel>, #tpu.dimension_semantics<arbitrary>], iteration_bounds = array<i64: 1, 1>, scalar_prefetch = 0 : i64, scratch_operands = 3 : i64, tpu.core_type = #tpu.core_type<tc>, window_params = [{transform_indices = @transform_0, window_bounds = array<i64: 16, 64>}, {transform_indices = @transform_1, window_bounds = array<i64: 1, 1, 128>}, {transform_indices = @transform_2, window_bounds = array<i64: 1, 1, 128>}]} {
    %c0_i32 = arith.constant 0 : i32
    %0 = arith.cmpi eq, %arg1, %c0_i32 : i32
    %1 = arith.extui %0 : i1 to i32
    %c0_i32_0 = arith.constant 0 : i32
    %2 = arith.cmpi ne, %1, %c0_i32_0 : i32
    scf.if %2 {
      %cst_17 = arith.constant 0.000000e+00 : f32
      %30 = vector.broadcast %cst_17 : f32 to vector<1x64xf32>
      %c0_18 = arith.constant 0 : index
      %c0_19 = arith.constant 0 : index
      %31 = vector.load %arg6[%c0_18, %c0_19] : memref<1x64xf32, #tpu.memory_space<vmem>>, vector<1x64xf32>
      tpu.vector_store %arg6[%c0_18, %c0_19], %30 {strides = array<i32>} : memref<1x64xf32, #tpu.memory_space<vmem>>, vector<1x64xf32>,
      %cst_20 = arith.constant 0.000000e+00 : f32
      %32 = vector.broadcast %cst_20 : f32 to vector<1x60xf32>
      %c0_21 = arith.constant 0 : index
      %c0_22 = arith.constant 0 : index
      %33 = vector.load %arg7[%c0_21, %c0_22] : memref<1x60xf32, #tpu.memory_space<vmem>>, vector<1x60xf32>
      tpu.vector_store %arg7[%c0_21, %c0_22], %32 {strides = array<i32>} : memref<1x60xf32, #tpu.memory_space<vmem>>, vector<1x60xf32>,
    } else {
    }
    %c0 = arith.constant 0 : index
    %c0_1 = arith.constant 0 : index
    %3 = vector.load %arg2[%c0, %c0_1] : memref<16x64xf32, #tpu.memory_space<vmem>>, vector<16x64xf32>
    %c0_i32_2 = arith.constant 0 : i32
    %4 = arith.cmpi sgt, %arg1, %c0_i32_2 : i32
    %5 = arith.extui %4 : i1 to i32
    %c0_i32_3 = arith.constant 0 : i32
    %6 = arith.cmpi ne, %5, %c0_i32_3 : i32
    scf.if %6 {
      %30 = vector.extract_strided_slice %3 {offsets = [0, 0], sizes = [1, 64], strides = [1, 1]} : vector<16x64xf32> to vector<1x64xf32>
      %c0_17 = arith.constant 0 : index
      %c0_18 = arith.constant 0 : index
      %31 = vector.load %arg5[%c0_17, %c0_18] : memref<1x64xf32, #tpu.memory_space<vmem>>, vector<1x64xf32>
      %32 = arith.subf %30, %31 : vector<1x64xf32>
      %33 = math.absf %32 : vector<1x64xf32>
      %c0_19 = arith.constant 0 : index
      %c0_20 = arith.constant 0 : index
      %34 = vector.load %arg6[%c0_19, %c0_20] : memref<1x64xf32, #tpu.memory_space<vmem>>, vector<1x64xf32>
      %35 = arith.addf %34, %33 : vector<1x64xf32>
      %c0_21 = arith.constant 0 : index
      %c0_22 = arith.constant 0 : index
      %36 = vector.load %arg6[%c0_21, %c0_22] : memref<1x64xf32, #tpu.memory_space<vmem>>, vector<1x64xf32>
      tpu.vector_store %arg6[%c0_21, %c0_22], %35 {strides = array<i32>} : memref<1x64xf32, #tpu.memory_space<vmem>>, vector<1x64xf32>,
    } else {
    }
    %7 = vector.extract_strided_slice %3 {offsets = [15, 0], sizes = [1, 64], strides = [1, 1]} : vector<16x64xf32> to vector<1x64xf32>
    %c0_4 = arith.constant 0 : index
    %c0_5 = arith.constant 0 : index
    %8 = vector.load %arg5[%c0_4, %c0_5] : memref<1x64xf32, #tpu.memory_space<vmem>>, vector<1x64xf32>
    tpu.vector_store %arg5[%c0_4, %c0_5], %7 {strides = array<i32>} : memref<1x64xf32, #tpu.memory_space<vmem>>, vector<1x64xf32>,
    %9 = vector.extract_strided_slice %3 {offsets = [0, 4], sizes = [16, 60], strides = [1, 1]} : vector<16x64xf32> to vector<16x60xf32>
    %10 = vector.extract_strided_slice %3 {offsets = [0, 0], sizes = [16, 60], strides = [1, 1]} : vector<16x64xf32> to vector<16x60xf32>
    %11 = arith.subf %9, %10 : vector<16x60xf32>
    %12 = math.absf %11 : vector<16x60xf32>
    %c0_6 = arith.constant 0 : index
    %c0_7 = arith.constant 0 : index
    %13 = vector.load %arg7[%c0_6, %c0_7] : memref<1x60xf32, #tpu.memory_space<vmem>>, vector<1x60xf32>
    %cst = arith.constant dense<0.000000e+00> : vector<60xf32>
    %14 = vector.multi_reduction <add>, %12, %cst [0] : vector<16x60xf32> to vector<60xf32>
    %15 = vector.shape_cast %14 : vector<60xf32> to vector<1x60xf32>
    %16 = arith.addf %13, %15 : vector<1x60xf32>
    %c0_8 = arith.constant 0 : index
    %c0_9 = arith.constant 0 : index
    %17 = vector.load %arg7[%c0_8, %c0_9] : memref<1x60xf32, #tpu.memory_space<vmem>>, vector<1x60xf32>
    tpu.vector_store %arg7[%c0_8, %c0_9], %16 {strides = array<i32>} : memref<1x60xf32, #tpu.memory_space<vmem>>, vector<1x60xf32>,
    %18 = vector.extract_strided_slice %3 {offsets = [1, 0], sizes = [15, 64], strides = [1, 1]} : vector<16x64xf32> to vector<15x64xf32>
    %19 = vector.extract_strided_slice %3 {offsets = [0, 0], sizes = [15, 64], strides = [1, 1]} : vector<16x64xf32> to vector<15x64xf32>
    %20 = arith.subf %18, %19 : vector<15x64xf32>
    %21 = math.absf %20 : vector<15x64xf32>
    %c0_10 = arith.constant 0 : index
    %c0_11 = arith.constant 0 : index
    %22 = vector.load %arg6[%c0_10, %c0_11] : memref<1x64xf32, #tpu.memory_space<vmem>>, vector<1x64xf32>
    %cst_12 = arith.constant dense<0.000000e+00> : vector<64xf32>
    %23 = vector.multi_reduction <add>, %21, %cst_12 [0] : vector<15x64xf32> to vector<64xf32>
    %24 = vector.shape_cast %23 : vector<64xf32> to vector<1x64xf32>
    %25 = arith.addf %22, %24 : vector<1x64xf32>
    %c0_13 = arith.constant 0 : index
    %c0_14 = arith.constant 0 : index
    %26 = vector.load %arg6[%c0_13, %c0_14] : memref<1x64xf32, #tpu.memory_space<vmem>>, vector<1x64xf32>
    tpu.vector_store %arg6[%c0_13, %c0_14], %25 {strides = array<i32>} : memref<1x64xf32, #tpu.memory_space<vmem>>, vector<1x64xf32>,
    %c0_i32_15 = arith.constant 0 : i32
    %27 = arith.cmpi eq, %arg1, %c0_i32_15 : i32
    %28 = arith.extui %27 : i1 to i32
    %c0_i32_16 = arith.constant 0 : i32
    %29 = arith.cmpi ne, %28, %c0_i32_16 : i32
    scf.if %29 {
      %c0_17 = arith.constant 0 : index
      %c0_18 = arith.constant 0 : index
      %30 = vector.load %arg6[%c0_17, %c0_18] : memref<1x64xf32, #tpu.memory_space<vmem>>, vector<1x64xf32>
      %cst_19 = arith.constant dense<0.000000e+00> : vector<1xf32>
      %31 = vector.multi_reduction <add>, %30, %cst_19 [1] : vector<1x64xf32> to vector<1xf32>
      %32 = vector.shape_cast %31 : vector<1xf32> to vector<1x1xf32>
      %c0_20 = arith.constant 0 : index
      %c0_21 = arith.constant 0 : index
      %33 = vector.load %arg7[%c0_20, %c0_21] : memref<1x60xf32, #tpu.memory_space<vmem>>, vector<1x60xf32>
      %cst_22 = arith.constant dense<0.000000e+00> : vector<1xf32>
      %34 = vector.multi_reduction <add>, %33, %cst_22 [1] : vector<1x60xf32> to vector<1xf32>
      %35 = vector.shape_cast %34 : vector<1xf32> to vector<1x1xf32>
      %36 = vector.shape_cast %32 : vector<1x1xf32> to vector<1x1x1xf32>
      %37 = vector.shape_cast %36 : vector<1x1x1xf32> to vector<1x1x1xf32>
      %38 = vector.broadcast %37 : vector<1x1x1xf32> to vector<1x1x128xf32>
      %c0_23 = arith.constant 0 : index
      %c0_24 = arith.constant 0 : index
      %c0_25 = arith.constant 0 : index
      %39 = vector.load %arg3[%c0_23, %c0_24, %c0_25] : memref<1x1x128xf32, #tpu.memory_space<vmem>>, vector<1x1x128xf32>
      tpu.vector_store %arg3[%c0_23, %c0_24, %c0_25], %38 {strides = array<i32>} : memref<1x1x128xf32, #tpu.memory_space<vmem>>, vector<1x1x128xf32>,
      %40 = vector.shape_cast %35 : vector<1x1xf32> to vector<1x1x1xf32>
      %41 = vector.shape_cast %40 : vector<1x1x1xf32> to vector<1x1x1xf32>
      %42 = vector.broadcast %41 : vector<1x1x1xf32> to vector<1x1x128xf32>
      %c0_26 = arith.constant 0 : index
      %c0_27 = arith.constant 0 : index
      %c0_28 = arith.constant 0 : index
      %43 = vector.load %arg4[%c0_26, %c0_27, %c0_28] : memref<1x1x128xf32, #tpu.memory_space<vmem>>, vector<1x1x128xf32>
      tpu.vector_store %arg4[%c0_26, %c0_27, %c0_28], %42 {strides = array<i32>} : memref<1x1x128xf32, #tpu.memory_space<vmem>>, vector<1x1x128xf32>,
    } else {
    }
    return
  }
  func.func @transform_0(%arg0: i32, %arg1: i32) -> (i32, i32) {
    %c1_i32 = arith.constant 1 : i32
    %0 = arith.muli %arg0, %c1_i32 : i32
    %1 = arith.addi %0, %arg1 : i32
    %c0_i32 = arith.constant 0 : i32
    %c0_i32_0 = arith.constant 0 : i32
    return %1, %c0_i32 : i32, i32
  }
  func.func @transform_1(%arg0: i32, %arg1: i32) -> (i32, i32, i32) {
    %c0_i32 = arith.constant 0 : i32
    %c0_i32_0 = arith.constant 0 : i32
    %c0_i32_1 = arith.constant 0 : i32
    return %arg0, %c0_i32, %c0_i32_0 : i32, i32, i32
  }
  func.func @transform_2(%arg0: i32, %arg1: i32) -> (i32, i32, i32) {
    %c0_i32 = arith.constant 0 : i32
    %c0_i32_0 = arith.constant 0 : i32
    %c0_i32_1 = arith.constant 0 : i32
    return %arg0, %c0_i32, %c0_i32_0 : i32, i32, i32
  }
}

</mosaic_0001>

<bundles_post_ra>
// kernel: spatial_loss.1
= control target key start
LH: loop header
LB: loop body
LE: loop exit
PB: predicated region body
PF: predicated region fallthrough
CT: control target
= control target key end

     0   :  { %s148_s13 = smov 4   ;;  %vm38_vm0 = vcmask 483328   ;;  %v149_v2 = vmov 0.0   ;;  %vm68_vm1 = vcmask 523296   ;;  %vm85_vm2 = vcmask 1040384   ;;  %s181_s0 = inlined_call_operand.vmem [shape: f32[16,64], index: 0, kind: input, shape index: {}]   ;;  %s182_s1 = inlined_call_operand.vmem [shape: f32[1,1,128], index: 1, kind: output, shape index: {0}]   ;;  %s183_s2 = inlined_call_operand.vmem [shape: f32[1,1,128], index: 2, kind: output, shape index: {1}]  }
   0x1   :  { %v40_v0 = vld [vmem:[%s181_s0] sm:$0xff]  ;;  %v41_v1 = vld [vmem:[%s181_s0 + $0x8] sm:$0xff]  ;;  %39 = vst.msk [vmem:[#allocation4] sm:$0x1] %vm38_vm0, %v149_v2  ;;  %s150_s0 = smov 124   ;;  %vm98_vm3 = vcmask 1046528  }
   0x2   :  { %57 = vrot.lane.b32.xlu0 %v40_v0, %s148_s13  ;;  %v87_v18 = vrot.slane %v41_v1, 7  ;;  %v86_v19 = vrot.slane %v40_v0, 7  ;;  %vm104_vm4 = vcmask 523264   ;;  %vm106_vm5 = vcmask 522240  }
   0x3   :  { %vm36_vm6 = vcmask 516096  }
   0x4   :  { %v88_v20 = vsel %vm85_vm2, %v86_v19, %v87_v18  ;;  %v91_v21 = vsub.f32 %v40_v0, %v86_v19  ;;  %37 = vst.msk [vmem:[#allocation3] sm:$0x1] %vm36_vm6, %v149_v2 }
   0x5   :  { %v92_v22 = vsub.f32 %v41_v1, %v88_v20 }
   0x6   :  { %v93_v23 = vand.u32 2147483647, %v91_v21 }
   0x7   :  { %v94_v24 = vand.u32 2147483647, %v92_v22 }
   0x8   :  { %v99_v25 = vrot.slane %v93_v23, 1  ;;  %v67_v41 = vld [vmem:[#allocation4] sm:$0x1] }
   0x9   :  { %v100_v26 = vrot.slane %v94_v24, 1 }
   0xa   :  { %59 = vrot.lane.b32.xlu0 %v41_v1, %s148_s13 }
   0xb   :  { %v101_v27 = vsel %vm98_vm3, %v99_v25, %v100_v26  ;;  %v107_v29 = vsel %vm106_vm5, %v100_v26, 0.0  ;;  %v95_v37 = vld [vmem:[#allocation3] sm:$0x1] }
   0xc   :  { %v105_v28 = vsel %vm104_vm4, %v101_v27, 0.0 }
   0xd   :  { %v108_v30 = vadd.f32 %v107_v29, %v105_v28 }
   0xf   :  { %v109_v31 = vrot.slane %v108_v30, 4 }
  0x11   :  { %v110_v32 = vadd.f32 %v109_v31, %v108_v30 }
  0x13   :  { %v111_v33 = vrot.slane %v110_v32, 2 }
  0x15   :  { %v112_v34 = vadd.f32 %v111_v33, %v110_v32 }
  0x17   :  { %v113_v35 = vrot.slane %v112_v34, 1 }
  0x19   :  { %v114_v36 = vadd.f32 %v113_v35, %v112_v34 }
  0x1b   :  { %v115_v38 = vadd.f32 %v114_v36, %v95_v37 }
  0x1d   :  { %117 = vst.msk [vmem:[#allocation3] sm:$0x1] %vm36_vm6, %v115_v38 }
  0x24   :  { %v121_v39 = vld [vmem:[#allocation3] sm:$0x1] }
  0x25   :  { %v122_v40 = vsel %vm36_vm6, %v121_v39, 0.0 }
  0x74   :  { %v58_v3 = vpop.permute.xlu0 %57 }
  0x75   :  { %v63_v4 = vsub.f32 %v40_v0, %v58_v3 }
  0x77   :  { %v65_v6 = vand.u32 2147483647, %v63_v4 }
  0x79   :  { %v69_v9 = vsel %vm68_vm1, %v65_v6, 0.0 }
  0x7c   :  { %v60_v5 = vpop.permute.xlu0 %59 }
  0x7d   :  { %v64_v7 = vsub.f32 %v41_v1, %v60_v5 }
  0x7f   :  { %v66_v8 = vand.u32 2147483647, %v64_v7 }
  0x81   :  { %v70_v10 = vsel %vm68_vm1, %v66_v8, 0.0 }
  0x82   :  { %v71_v11 = vadd.f32 %v70_v10, %v69_v9 }
  0x84   :  { %v72_v12 = vrot.slane %v71_v11, 4 }
  0x86   :  { %v73_v13 = vadd.f32 %v72_v12, %v71_v11 }
  0x88   :  { %v74_v14 = vrot.slane %v73_v13, 2 }
  0x8a   :  { %v75_v15 = vadd.f32 %v74_v14, %v73_v13 }
  0x8c   :  { %v76_v16 = vrot.slane %v75_v15, 1 }
  0x8e   :  { %v77_v17 = vadd.f32 %v76_v16, %v75_v15 }
  0x90   :  { %79 = vrot.lane.b32.xlu1 %v77_v17, %s150_s0 }
  0xba   :  { %123 = vadd.xlane.f32.xlu1 %v122_v40 }
 0x102   :  { %v80_v42 = vpop.permute.xlu1 %79 }
 0x103   :  { %v82_v43 = vadd.f32 %v80_v42, %v67_v41 }
 0x105   :  { %84 = vst.msk [vmem:[#allocation4] sm:$0x1] %vm38_vm0, %v82_v43 }
 0x10c   :  { %v125_v44 = vld [vmem:[#allocation4] sm:$0x1] }
 0x10d   :  { %v126_v45 = vsel %vm38_vm0, %v125_v44, 0.0 }
 0x10e   :  { %127 = vadd.xlane.f32.xlu2 %v126_v45 }
 0x12d   :  { %v124_v46 = vpop.xlane.xlu1 %123 }
 0x12e   :  { %129 = vst [vmem:[%s182_s1] sm:$0x1] %v124_v46 }
 0x181   :  { %v128_v47 = vpop.xlane.xlu2 %127 }
 0x182   :  { %130 = vst [vmem:[%s183_s2] sm:$0x1] %v128_v47 }

</bundles_post_ra>
